<compile_context>
chip_gen: v5e
topology: v5e:2x2
jax: 0.10.0
libtpu: 0.0.40
codegen_flags: <defaults>
</compile_context>

<pallas_src>
from typing import Tuple, Union

import numpy as np
import jax
import jax.numpy as jnp
from jax import lax
from jax.experimental import pallas as pl
from jax.experimental.pallas import tpu as pltpu


def _pair(v) -> Tuple[int, int]:
    if isinstance(v, int):
        return (v, v)
    if isinstance(v, (list, tuple)):
        a, b = v
        return (int(a), int(b))
    raise ValueError("Invalid size.")


def _cdiv(a: int, b: int) -> int:
    return -(-a // b)


def _vmem_capacity_bytes() -> int:
    try:
        return int(pltpu.get_tpu_info().vmem_capacity_bytes)
    except Exception:
        return 64 * 1024 * 1024  # conservative (v7x per-TC VMEM)


class StreamConvTranspose2dPallas:
    """JAX/Pallas port of stream/modules/convolution.py::StreamConvTranspose2d."""

    MAX_LANE_TILE = 2048  # per-phase output lanes per grid step (multiple of 128)

    def __init__(self, in_channels: int, out_channels: int,
                 kernel_size: Union[int, Tuple[int, int]],
                 stride: Union[int, Tuple[int, int]] = 1,
                 padding: Union[int, Tuple[int, int]] = 0,
                 dilation: Union[int, Tuple[int, int]] = 1,
                 groups: int = 1, bias: bool = True,
                 compute_dtype=jnp.bfloat16, out_dtype=jnp.float32, key=None):
        self.in_channels = in_channels
        self.out_channels = out_channels
        self.T_size, self.F_size = _pair(kernel_size)
        self.T_stride, self.F_stride = _pair(stride)
        assert self.T_stride == 1
        self.T_pad, self.F_pad = _pair(padding)
        assert self.T_pad == 0
        self.T_dilation, self.F_dilation = _pair(dilation)
        assert groups == 1  # TODO(synk): grouped conv not implemented in this kernel
        self.use_bias = bias
        self.compute_dtype = compute_dtype
        self.out_dtype = out_dtype

        # Frequency padding of the (virtual) zero-inserted upsampled signal.
        if self.F_stride > 1:
            left_pad = self.F_stride - 1
            assert self.F_size > 1 and left_pad <= self.F_size - 1
            self.pad_l = (self.F_size - 1) * self.F_dilation - self.F_pad
            self.pad_r = self.pad_l - left_pad
        else:
            self.pad_l = (self.F_size - 1) * self.F_dilation - self.F_pad
            self.pad_r = self.pad_l

        # ---- polyphase tap table (F-independent, built once) --------------------
        # Output column f belongs to phase p = f % F_stride.  For phase p only the
        # kf taps with (p + kf*Fd - pad_l) % Fs == 0 are non-zero, and their source
        # column in the RAW (un-upsampled) input is j + off with
        # off = (p + kf*Fd - pad_l) // Fs  (f = p + Fs*j).
        Fs, Fd, Fk = self.F_stride, self.F_dilation, self.F_size
        self.taps = []
        offs = []
        for p in range(Fs):
            tp = []
            for kf in range(Fk):
                r = p + kf * Fd - self.pad_l
                if r % Fs == 0:
                    off = r // Fs
                    tp.append((kf, off))
                    offs.append(off)
            self.taps.append(tp)
        self.min_off = min(offs) if offs else 0
        self.max_off = max(offs) if offs else 0

        # Deterministic parameter init (matches nn.Conv2d parameter shapes).
        if key is None:
            key = jax.random.PRNGKey(0)
        k_w, k_b = jax.random.split(key)
        fan_in = in_channels * self.T_size * self.F_size
        bound = 1.0 / (fan_in ** 0.5)
        self.weight = jax.random.uniform(
            k_w, (out_channels, in_channels, self.T_size, self.F_size),
            dtype=jnp.float32, minval=-bound, maxval=bound)
        if bias:
            self.bias = jax.random.uniform(
                k_b, (out_channels,), dtype=jnp.float32,
                minval=-bound, maxval=bound)
        else:
            self.bias = jnp.zeros((out_channels,), dtype=jnp.float32)

        # Kernel-ready layouts built once:
        #   weights per tap: (Tk, Fk, Cout, Cin)  -> w_ref[kt, kf] is a clean
        #   (Cout, Cin) tile (no in-kernel relayout); bias kept in f32 for the epilogue.
        self.w_taps = jnp.transpose(self.weight, (2, 3, 0, 1)).astype(compute_dtype)
        self.bias2d = self.bias.reshape(out_channels, 1).astype(jnp.float32)

    # ---- forward ----------------------------------------------------------------
    def __call__(self, x, cache):
        inp = jnp.concatenate([cache, x], axis=2)            # (bs, Cin, T, F)
        out_cache = inp[:, :, 1:]
        bs, Cin, T, F = inp.shape
        assert Cin == self.in_channels
        Cout = self.out_channels
        Tk, Fk = self.T_size, self.F_size
        Td, Fd = self.T_dilation, self.F_dilation
        Fs = self.F_stride

        T_out = T - Td * (Tk - 1)
        F_out = F * Fs + self.pad_l + self.pad_r - Fd * (Fk - 1)
        assert T_out >= 1 and F_out >= 1

        # Per-phase output width and lane tiling (only tile when genuinely large).
        Lmax = _cdiv(F_out, Fs)
        if Lmax <= self.MAX_LANE_TILE:
            n_tiles, lane_tile = 1, Lmax
        else:
            n_tiles = _cdiv(Lmax, self.MAX_LANE_TILE)
            lane_tile = _cdiv(_cdiv(Lmax, n_tiles), 128) * 128
        Lpad = n_tiles * lane_tile

        # Small zero pre-pad of the raw input so every tap slice is in range
        # (this replaces the virtual pad_l/pad_r of the upsampled signal).
        pad_left = max(0, -self.min_off)
        pad_right = max(0, self.max_off + Lpad - 1 - (F - 1))
        Fp_in = F + pad_left + pad_right

        # One cheap input-sized pass: cast (bf16 BEFORE layout work) + pad + put
        # (Cin, F) in the tiled dims so tap slices are direct sub-tile loads.
        x_prep = jnp.pad(inp.astype(self.compute_dtype),
                         ((0, 0), (0, 0), (0, 0), (pad_left, pad_right)))
        x_prep = jnp.transpose(x_prep, (0, 2, 1, 3))          # (bs, T, Cin, Fp_in)

        taps = self.taps
        tiled = n_tiles > 1

        def kernel(x_ref, w_ref, b_ref, o_ref):
            # x_ref: (1, T, Cin, Fp_in)   w_ref: (Tk, Fk, Cout, Cin)
            # b_ref: (Cout, 1) f32        o_ref: (1, Fs*T_out, Cout, lane_tile)
            if tiled:
                f0 = pl.multiple_of(pl.program_id(1) * lane_tile, 128)
            bias = b_ref[...]                                  # f32 epilogue bias
            for t in range(T_out):
                for p in range(Fs):
                    acc = None
                    for kt in range(Tk):
                        t_in = t + kt * Td
                        for kf, off in taps[p]:
                            start = pad_left + off
                            idx = start + f0 if tiled else start
                            xs = x_ref[0, t_in, :, pl.ds(idx, lane_tile)]  # (Cin, L)
                            d = jnp.dot(w_ref[kt, kf], xs,
                                        preferred_element_type=jnp.float32)
                            acc = d if acc is None else acc + d
                    if acc is None:  # phase with no valid taps -> bias only
                        acc = jnp.zeros((Cout, lane_tile), jnp.float32)
                    o_ref[0, p * T_out + t, :, :] = (acc + bias).astype(o_ref.dtype)

        csize = np.dtype(self.compute_dtype).itemsize
        osize = np.dtype(self.out_dtype).itemsize

        # Advisory cost estimate for XLA scheduling.
        n_dot = bs * n_tiles * T_out * Tk * sum(len(tp) for tp in taps)
        flops = int(2 * n_dot * Cout * Cin * lane_tile)
        bytes_accessed = int(bs * T * Cin * Fp_in * csize
                             + Tk * Fk * Cout * Cin * csize + Cout * 4
                             + bs * Fs * T_out * Cout * Lpad * osize)

        # VMEM budget: actual (double-buffered) block footprint vs device capacity.
        in_block = T * Cin * Fp_in * csize
        out_block = Fs * T_out * Cout * lane_tile * osize
        w_block = Tk * Fk * _cdiv(Cout, 8) * 8 * _cdiv(Cin, 128) * 128 * csize
        est = 2 * (in_block + out_block) + 2 * w_block + (1 << 20)
        cap = _vmem_capacity_bytes()
        vmem_limit = int(max(32 << 20, min(int(0.8 * cap), 2 * est)))

        out4 = pl.pallas_call(
            kernel,
            grid=(bs, n_tiles),
            in_specs=[
                pl.BlockSpec((1, T, Cin, Fp_in), lambda b, l: (b, 0, 0, 0)),
                pl.BlockSpec((Tk, Fk, Cout, Cin), lambda b, l: (0, 0, 0, 0)),
                pl.BlockSpec((Cout, 1), lambda b, l: (0, 0)),
            ],
            out_specs=pl.BlockSpec((1, Fs * T_out, Cout, lane_tile),
                                   lambda b, l: (b, 0, 0, l)),
            out_shape=jax.ShapeDtypeStruct((bs, Fs * T_out, Cout, Lpad),
                                           self.out_dtype),
            compiler_params=pltpu.CompilerParams(
                dimension_semantics=("parallel", "parallel"),
                vmem_limit_bytes=vmem_limit),
            cost_estimate=pl.CostEstimate(flops=flops, transcendentals=0,
                                          bytes_accessed=bytes_accessed),
        )(x_prep, self.w_taps, self.bias2d)

        # Phase interleave back to NCHW: out4[b, p*T_out+t, co, j] = y[b, co, t, p+Fs*j].
        # This is the ONLY output-sized wrapper op.
        # TODO(synk): move this interleave in-kernel (strided lane store / roll swizzle).
        out5 = out4.reshape(bs, Fs, T_out, Cout, Lpad)
        out = jnp.transpose(out5, (0, 3, 2, 4, 1)).reshape(bs, Cout, T_out, Lpad * Fs)
        out = out[..., :F_out]
        return out, out_cache

    # ---- pure-JAX reference (materialized upsample/pad + dilated conv) ----------
    def reference(self, x, cache):
        inp = jnp.concatenate([cache, x], axis=2)
        out_cache = inp[:, :, 1:]
        bs, C, T, F = inp.shape
        if self.F_stride > 1:
            zeros = jnp.zeros((bs, C, T, F, self.F_stride - 1), dtype=inp.dtype)
            inp_up = jnp.concatenate([inp[..., None], zeros], axis=-1)
            inp_up = inp_up.reshape(bs, C, T, F * self.F_stride)
        else:
            inp_up = inp
        inp_p = lax.pad(inp_up, jnp.array(0.0, inp_up.dtype),
                        ((0, 0, 0), (0, 0, 0), (0, 0, 0), (self.pad_l, self.pad_r, 0)))
        ref = lax.conv_general_dilated(
            inp_p, self.weight,
            window_strides=(1, 1), padding="VALID",
            rhs_dilation=(self.T_dilation, self.F_dilation),
            dimension_numbers=("NCHW", "OIHW", "NCHW"),
            precision=lax.Precision.HIGHEST)
        if self.use_bias:
            ref = ref + self.bias.reshape(1, -1, 1, 1)
        return ref, out_cache


if __name__ == "__main__":
    key = jax.random.PRNGKey(0)
    k_x, k_c, k_p = jax.random.split(key, 3)

    bs, Cin, Cout, F = 2, 4, 8, 16
    kernel_size = (3, 3)      # (T_size, F_size)
    stride = (1, 2)           # T_stride must be 1
    padding = (0, 1)          # T_pad must be 0
    dilation = (1, 1)
    T_size = kernel_size[0]

    x = jax.random.normal(k_x, (bs, Cin, 1, F), dtype=jnp.float32)
    cache = jax.random.normal(k_c, (bs, Cin, T_size - 1, F), dtype=jnp.float32)

    # float32 operand path: check against the XLA dilated-conv reference.
    mod = StreamConvTranspose2dPallas(Cin, Cout, kernel_size, stride=stride,
                                      padding=padding, dilation=dilation,
                                      groups=1, bias=True,
                                      compute_dtype=jnp.float32, key=k_p)
    out, out_cache = mod(x, cache)
    out = jax.block_until_ready(out)
    out_cache = jax.block_until_ready(out_cache)

    ref_out, ref_cache = mod.reference(x, cache)
    assert out.shape == ref_out.shape, (out.shape, ref_out.shape)
    # tolerant of the TPU's default matmul/conv precision mode
    assert jnp.allclose(out, ref_out, atol=1e-2, rtol=1e-2)
    assert jnp.allclose(out_cache, ref_cache)

    # bf16 operand path (recommended default on v5e/v6e/v7x): bf16 operands,
    # f32 MXU accumulation, f32 bias epilogue.
    mod_bf16 = StreamConvTranspose2dPallas(Cin, Cout, kernel_size, stride=stride,
                                           padding=padding, dilation=dilation,
                                           groups=1, bias=True,
                                           compute_dtype=jnp.bfloat16, key=k_p)
    out16, _ = mod_bf16(x, cache)
    out16 = jax.block_until_ready(out16)
    assert out16.shape == ref_out.shape
    assert jnp.allclose(out16, ref_out, atol=5e-2, rtol=5e-2)

    print("KERNEL_OK")
</pallas_src>

<mosaic_0001>
module attributes {stable_mosaic.version = 11 : i64} {
  func.func @kernel(%arg0: i32, %arg1: i32, %arg2: memref<1x3x4x17xf32, #tpu.memory_space<vmem>>, %arg3: memref<3x3x8x4xf32, #tpu.memory_space<vmem>>, %arg4: memref<8x1xf32, #tpu.memory_space<vmem>>, %arg5: memref<1x2x8x16xf32, #tpu.memory_space<vmem>>) attributes {dimension_semantics = [#tpu.dimension_semantics<parallel>, #tpu.dimension_semantics<parallel>], iteration_bounds = array<i64: 2, 1>, scalar_prefetch = 0 : i64, scratch_operands = 0 : i64, tpu.core_type = #tpu.core_type<tc>, window_params = [{transform_indices = @transform_0, window_bounds = array<i64: 1, 3, 4, 17>}, {pipeline_mode = #tpu.pipeline_mode<synchronous>, transform_indices = @transform_1, window_bounds = array<i64: 3, 3, 8, 4>}, {pipeline_mode = #tpu.pipeline_mode<synchronous>, transform_indices = @transform_2, window_bounds = array<i64: 8, 1>}, {transform_indices = @transform_3, window_bounds = array<i64: 1, 2, 8, 16>}]} {
    %c0 = arith.constant 0 : index
    %c0_0 = arith.constant 0 : index
    %0 = vector.load %arg4[%c0, %c0_0] : memref<8x1xf32, #tpu.memory_space<vmem>>, vector<8x1xf32>
    %c0_1 = arith.constant 0 : index
    %c0_2 = arith.constant 0 : index
    %c0_3 = arith.constant 0 : index
    %c0_4 = arith.constant 0 : index
    %1 = vector.load %arg2[%c0_1, %c0_2, %c0_3, %c0_4] : memref<1x3x4x17xf32, #tpu.memory_space<vmem>>, vector<1x1x4x16xf32>
    %2 = vector.shape_cast %1 : vector<1x1x4x16xf32> to vector<4x16xf32>
    %c0_5 = arith.constant 0 : index
    %c1 = arith.constant 1 : index
    %c0_6 = arith.constant 0 : index
    %c0_7 = arith.constant 0 : index
    %3 = vector.load %arg3[%c0_5, %c1, %c0_6, %c0_7] : memref<3x3x8x4xf32, #tpu.memory_space<vmem>>, vector<1x1x8x4xf32>
    %4 = vector.shape_cast %3 : vector<1x1x8x4xf32> to vector<8x4xf32>
    %cst = arith.constant dense<0.000000e+00> : vector<8x16xf32>
    %5 = tpu.matmul %4, %2, %cst {dimension_numbers = #tpu.dot_dimension_numbers<[1], [0], [0], [1], [0, 0, 1, 1], [], []>} : vector<8x4xf32>, vector<4x16xf32>, vector<8x16xf32> -> vector<8x16xf32>
    %c0_8 = arith.constant 0 : index
    %c1_9 = arith.constant 1 : index
    %c0_10 = arith.constant 0 : index
    %c0_11 = arith.constant 0 : index
    %6 = vector.load %arg2[%c0_8, %c1_9, %c0_10, %c0_11] : memref<1x3x4x17xf32, #tpu.memory_space<vmem>>, vector<1x1x4x16xf32>
    %7 = vector.shape_cast %6 : vector<1x1x4x16xf32> to vector<4x16xf32>
    %c1_12 = arith.constant 1 : index
    %c1_13 = arith.constant 1 : index
    %c0_14 = arith.constant 0 : index
    %c0_15 = arith.constant 0 : index
    %8 = vector.load %arg3[%c1_12, %c1_13, %c0_14, %c0_15] : memref<3x3x8x4xf32, #tpu.memory_space<vmem>>, vector<1x1x8x4xf32>
    %9 = vector.shape_cast %8 : vector<1x1x8x4xf32> to vector<8x4xf32>
    %cst_16 = arith.constant dense<0.000000e+00> : vector<8x16xf32>
    %10 = tpu.matmul %9, %7, %cst_16 {dimension_numbers = #tpu.dot_dimension_numbers<[1], [0], [0], [1], [0, 0, 1, 1], [], []>} : vector<8x4xf32>, vector<4x16xf32>, vector<8x16xf32> -> vector<8x16xf32>
    %11 = arith.addf %5, %10 : vector<8x16xf32>
    %c0_17 = arith.constant 0 : index
    %c2 = arith.constant 2 : index
    %c0_18 = arith.constant 0 : index
    %c0_19 = arith.constant 0 : index
    %12 = vector.load %arg2[%c0_17, %c2, %c0_18, %c0_19] : memref<1x3x4x17xf32, #tpu.memory_space<vmem>>, vector<1x1x4x16xf32>
    %13 = vector.shape_cast %12 : vector<1x1x4x16xf32> to vector<4x16xf32>
    %c2_20 = arith.constant 2 : index
    %c1_21 = arith.constant 1 : index
    %c0_22 = arith.constant 0 : index
    %c0_23 = arith.constant 0 : index
    %14 = vector.load %arg3[%c2_20, %c1_21, %c0_22, %c0_23] : memref<3x3x8x4xf32, #tpu.memory_space<vmem>>, vector<1x1x8x4xf32>
    %15 = vector.shape_cast %14 : vector<1x1x8x4xf32> to vector<8x4xf32>
    %cst_24 = arith.constant dense<0.000000e+00> : vector<8x16xf32>
    %16 = tpu.matmul %15, %13, %cst_24 {dimension_numbers = #tpu.dot_dimension_numbers<[1], [0], [0], [1], [0, 0, 1, 1], [], []>} : vector<8x4xf32>, vector<4x16xf32>, vector<8x16xf32> -> vector<8x16xf32>
    %17 = arith.addf %11, %16 : vector<8x16xf32>
    %18 = vector.broadcast %0 : vector<8x1xf32> to vector<8x16xf32>
    %19 = arith.addf %17, %18 : vector<8x16xf32>
    %c0_25 = arith.constant 0 : index
    %c0_26 = arith.constant 0 : index
    %c0_27 = arith.constant 0 : index
    %c0_28 = arith.constant 0 : index
    %20 = vector.load %arg5[%c0_25, %c0_26, %c0_27, %c0_28] : memref<1x2x8x16xf32, #tpu.memory_space<vmem>>, vector<1x1x8x16xf32>
    %21 = vector.shape_cast %20 : vector<1x1x8x16xf32> to vector<8x16xf32>
    %22 = vector.shape_cast %19 : vector<8x16xf32> to vector<1x1x8x16xf32>
    tpu.vector_store %arg5[%c0_25, %c0_26, %c0_27, %c0_28], %22 {strides = array<i32>} : memref<1x2x8x16xf32, #tpu.memory_space<vmem>>, vector<1x1x8x16xf32>,
    %c0_29 = arith.constant 0 : index
    %c0_30 = arith.constant 0 : index
    %c0_31 = arith.constant 0 : index
    %c0_32 = arith.constant 0 : index
    %23 = vector.load %arg2[%c0_29, %c0_30, %c0_31, %c0_32] : memref<1x3x4x17xf32, #tpu.memory_space<vmem>>, vector<1x1x4x16xf32>
    %24 = vector.shape_cast %23 : vector<1x1x4x16xf32> to vector<4x16xf32>
    %c0_33 = arith.constant 0 : index
    %c0_34 = arith.constant 0 : index
    %c0_35 = arith.constant 0 : index
    %c0_36 = arith.constant 0 : index
    %25 = vector.load %arg3[%c0_33, %c0_34, %c0_35, %c0_36] : memref<3x3x8x4xf32, #tpu.memory_space<vmem>>, vector<1x1x8x4xf32>
    %26 = vector.shape_cast %25 : vector<1x1x8x4xf32> to vector<8x4xf32>
    %cst_37 = arith.constant dense<0.000000e+00> : vector<8x16xf32>
    %27 = tpu.matmul %26, %24, %cst_37 {dimension_numbers = #tpu.dot_dimension_numbers<[1], [0], [0], [1], [0, 0, 1, 1], [], []>} : vector<8x4xf32>, vector<4x16xf32>, vector<8x16xf32> -> vector<8x16xf32>
    %c0_38 = arith.constant 0 : index
    %c0_39 = arith.constant 0 : index
    %c0_40 = arith.constant 0 : index
    %c1_41 = arith.constant 1 : index
    %28 = vector.load %arg2[%c0_38, %c0_39, %c0_40, %c1_41] : memref<1x3x4x17xf32, #tpu.memory_space<vmem>>, vector<1x1x4x16xf32>
    %29 = vector.shape_cast %28 : vector<1x1x4x16xf32> to vector<4x16xf32>
    %c0_42 = arith.constant 0 : index
    %c2_43 = arith.constant 2 : index
    %c0_44 = arith.constant 0 : index
    %c0_45 = arith.constant 0 : index
    %30 = vector.load %arg3[%c0_42, %c2_43, %c0_44, %c0_45] : memref<3x3x8x4xf32, #tpu.memory_space<vmem>>, vector<1x1x8x4xf32>
    %31 = vector.shape_cast %30 : vector<1x1x8x4xf32> to vector<8x4xf32>
    %cst_46 = arith.constant dense<0.000000e+00> : vector<8x16xf32>
    %32 = tpu.matmul %31, %29, %cst_46 {dimension_numbers = #tpu.dot_dimension_numbers<[1], [0], [0], [1], [0, 0, 1, 1], [], []>} : vector<8x4xf32>, vector<4x16xf32>, vector<8x16xf32> -> vector<8x16xf32>
    %33 = arith.addf %27, %32 : vector<8x16xf32>
    %c0_47 = arith.constant 0 : index
    %c1_48 = arith.constant 1 : index
    %c0_49 = arith.constant 0 : index
    %c0_50 = arith.constant 0 : index
    %34 = vector.load %arg2[%c0_47, %c1_48, %c0_49, %c0_50] : memref<1x3x4x17xf32, #tpu.memory_space<vmem>>, vector<1x1x4x16xf32>
    %35 = vector.shape_cast %34 : vector<1x1x4x16xf32> to vector<4x16xf32>
    %c1_51 = arith.constant 1 : index
    %c0_52 = arith.constant 0 : index
    %c0_53 = arith.constant 0 : index
    %c0_54 = arith.constant 0 : index
    %36 = vector.load %arg3[%c1_51, %c0_52, %c0_53, %c0_54] : memref<3x3x8x4xf32, #tpu.memory_space<vmem>>, vector<1x1x8x4xf32>
    %37 = vector.shape_cast %36 : vector<1x1x8x4xf32> to vector<8x4xf32>
    %cst_55 = arith.constant dense<0.000000e+00> : vector<8x16xf32>
    %38 = tpu.matmul %37, %35, %cst_55 {dimension_numbers = #tpu.dot_dimension_numbers<[1], [0], [0], [1], [0, 0, 1, 1], [], []>} : vector<8x4xf32>, vector<4x16xf32>, vector<8x16xf32> -> vector<8x16xf32>
    %39 = arith.addf %33, %38 : vector<8x16xf32>
    %c0_56 = arith.constant 0 : index
    %c1_57 = arith.constant 1 : index
    %c0_58 = arith.constant 0 : index
    %c1_59 = arith.constant 1 : index
    %40 = vector.load %arg2[%c0_56, %c1_57, %c0_58, %c1_59] : memref<1x3x4x17xf32, #tpu.memory_space<vmem>>, vector<1x1x4x16xf32>
    %41 = vector.shape_cast %40 : vector<1x1x4x16xf32> to vector<4x16xf32>
    %c1_60 = arith.constant 1 : index
    %c2_61 = arith.constant 2 : index
    %c0_62 = arith.constant 0 : index
    %c0_63 = arith.constant 0 : index
    %42 = vector.load %arg3[%c1_60, %c2_61, %c0_62, %c0_63] : memref<3x3x8x4xf32, #tpu.memory_space<vmem>>, vector<1x1x8x4xf32>
    %43 = vector.shape_cast %42 : vector<1x1x8x4xf32> to vector<8x4xf32>
    %cst_64 = arith.constant dense<0.000000e+00> : vector<8x16xf32>
    %44 = tpu.matmul %43, %41, %cst_64 {dimension_numbers = #tpu.dot_dimension_numbers<[1], [0], [0], [1], [0, 0, 1, 1], [], []>} : vector<8x4xf32>, vector<4x16xf32>, vector<8x16xf32> -> vector<8x16xf32>
    %45 = arith.addf %39, %44 : vector<8x16xf32>
    %c0_65 = arith.constant 0 : index
    %c2_66 = arith.constant 2 : index
    %c0_67 = arith.constant 0 : index
    %c0_68 = arith.constant 0 : index
    %46 = vector.load %arg2[%c0_65, %c2_66, %c0_67, %c0_68] : memref<1x3x4x17xf32, #tpu.memory_space<vmem>>, vector<1x1x4x16xf32>
    %47 = vector.shape_cast %46 : vector<1x1x4x16xf32> to vector<4x16xf32>
    %c2_69 = arith.constant 2 : index
    %c0_70 = arith.constant 0 : index
    %c0_71 = arith.constant 0 : index
    %c0_72 = arith.constant 0 : index
    %48 = vector.load %arg3[%c2_69, %c0_70, %c0_71, %c0_72] : memref<3x3x8x4xf32, #tpu.memory_space<vmem>>, vector<1x1x8x4xf32>
    %49 = vector.shape_cast %48 : vector<1x1x8x4xf32> to vector<8x4xf32>
    %cst_73 = arith.constant dense<0.000000e+00> : vector<8x16xf32>
    %50 = tpu.matmul %49, %47, %cst_73 {dimension_numbers = #tpu.dot_dimension_numbers<[1], [0], [0], [1], [0, 0, 1, 1], [], []>} : vector<8x4xf32>, vector<4x16xf32>, vector<8x16xf32> -> vector<8x16xf32>
    %51 = arith.addf %45, %50 : vector<8x16xf32>
    %c0_74 = arith.constant 0 : index
    %c2_75 = arith.constant 2 : index
    %c0_76 = arith.constant 0 : index
    %c1_77 = arith.constant 1 : index
    %52 = vector.load %arg2[%c0_74, %c2_75, %c0_76, %c1_77] : memref<1x3x4x17xf32, #tpu.memory_space<vmem>>, vector<1x1x4x16xf32>
    %53 = vector.shape_cast %52 : vector<1x1x4x16xf32> to vector<4x16xf32>
    %c2_78 = arith.constant 2 : index
    %c2_79 = arith.constant 2 : index
    %c0_80 = arith.constant 0 : index
    %c0_81 = arith.constant 0 : index
    %54 = vector.load %arg3[%c2_78, %c2_79, %c0_80, %c0_81] : memref<3x3x8x4xf32, #tpu.memory_space<vmem>>, vector<1x1x8x4xf32>
    %55 = vector.shape_cast %54 : vector<1x1x8x4xf32> to vector<8x4xf32>
    %cst_82 = arith.constant dense<0.000000e+00> : vector<8x16xf32>
    %56 = tpu.matmul %55, %53, %cst_82 {dimension_numbers = #tpu.dot_dimension_numbers<[1], [0], [0], [1], [0, 0, 1, 1], [], []>} : vector<8x4xf32>, vector<4x16xf32>, vector<8x16xf32> -> vector<8x16xf32>
    %57 = arith.addf %51, %56 : vector<8x16xf32>
    %58 = vector.broadcast %0 : vector<8x1xf32> to vector<8x16xf32>
    %59 = arith.addf %57, %58 : vector<8x16xf32>
    %c0_83 = arith.constant 0 : index
    %c1_84 = arith.constant 1 : index
    %c0_85 = arith.constant 0 : index
    %c0_86 = arith.constant 0 : index
    %60 = vector.load %arg5[%c0_83, %c1_84, %c0_85, %c0_86] : memref<1x2x8x16xf32, #tpu.memory_space<vmem>>, vector<1x1x8x16xf32>
    %61 = vector.shape_cast %60 : vector<1x1x8x16xf32> to vector<8x16xf32>
    %62 = vector.shape_cast %59 : vector<8x16xf32> to vector<1x1x8x16xf32>
    tpu.vector_store %arg5[%c0_83, %c1_84, %c0_85, %c0_86], %62 {strides = array<i32>} : memref<1x2x8x16xf32, #tpu.memory_space<vmem>>, vector<1x1x8x16xf32>,
    return
  }
  func.func @transform_0(%arg0: i32, %arg1: i32) -> (i32, i32, i32, i32) {
    %c0_i32 = arith.constant 0 : i32
    %c0_i32_0 = arith.constant 0 : i32
    %c0_i32_1 = arith.constant 0 : i32
    %c0_i32_2 = arith.constant 0 : i32
    return %arg0, %c0_i32, %c0_i32_0, %c0_i32_1 : i32, i32, i32, i32
  }
  func.func @transform_1(%arg0: i32, %arg1: i32) -> (i32, i32, i32, i32) {
    %c0_i32 = arith.constant 0 : i32
    %c0_i32_0 = arith.constant 0 : i32
    %c0_i32_1 = arith.constant 0 : i32
    %c0_i32_2 = arith.constant 0 : i32
    %c0_i32_3 = arith.constant 0 : i32
    return %c0_i32, %c0_i32_0, %c0_i32_1, %c0_i32_2 : i32, i32, i32, i32
  }
  func.func @transform_2(%arg0: i32, %arg1: i32) -> (i32, i32) {
    %c0_i32 = arith.constant 0 : i32
    %c0_i32_0 = arith.constant 0 : i32
    %c0_i32_1 = arith.constant 0 : i32
    return %c0_i32, %c0_i32_0 : i32, i32
  }
  func.func @transform_3(%arg0: i32, %arg1: i32) -> (i32, i32, i32, i32) {
    %c0_i32 = arith.constant 0 : i32
    %c0_i32_0 = arith.constant 0 : i32
    %c0_i32_1 = arith.constant 0 : i32
    return %arg0, %c0_i32, %c0_i32_0, %arg1 : i32, i32, i32, i32
  }
}

</mosaic_0001>

<bundles_post_ra>
// kernel: tpu_custom_call.1
= control target key start
LH: loop header
LB: loop body
LE: loop exit
PB: predicated region body
PF: predicated region fallthrough
CT: control target
= control target key end

     0   :  { %8 = vsyncpa [#allocation3], 0  ;;  %s914_s0 = inlined_call_operand.vmem [shape: f32[2,3,4,17], index: 0, kind: input, shape index: {}]   ;;  %s915_s1 = inlined_call_operand.vmem [shape: f32[3,3,8,4], index: 1, kind: input, shape index: {}]   ;;  %s916_s2 = inlined_call_operand.vmem [shape: f32[8,1], index: 2, kind: input, shape index: {}]   ;;  %s917_s3 = inlined_call_operand.hbm [shape: f32[2,2,8,16], index: 3, kind: output, shape index: {}]  }
   0x1   :  { %10 = vsyncpa [#allocation3 + $0x1], 0  ;;  %s763_s12 = smov 0   ;;  %s765_s13 = smov 0  }
   0x2   :  { %s767_s14 = smov 0   ;;  %s769_s15 = smov 0  }
   0x3   :  { %s771_s16 = smov 0   ;;  %s773_s17 = smov 0  }
   0x4 LB: > { %s553_s18 = sadd.s32 4294967295, %s737_s17   ;;  %s554_s19 = sadd.s32 4294967294, %s737_s17   ;;  %s737_s17 = sphi %s773_s17, %s16_s17   ;;  %s733_s16 = sphi %s771_s16, %s924_s16   ;;  %s729_s15 = sphi %s769_s15, %s923_s15   ;;  %s725_s14 = sphi %s767_s14, %s922_s14   ;;  %s721_s13 = sphi %s765_s13, %s921_s13   ;;  %s717_s12 = sphi %s763_s12, %s920_s12  }
   0x5   : > { %s28_s20 = sadd.s32 1, %s733_s16  ;;  %s105_s21 = sadd.s32 1, %s725_s14 }
   0x6   : > { %p30_p0 = scmp.ge.s32.totalorder %s28_s20, 2  ;;  %p115_p1 = scmp.ne.s32.totalorder %s725_s14, %s721_s13 }
   0x7   : > { %p116_p2 = scmp.eq.s32.totalorder %s553_s18, 1  ;;  %p121_p3 = scmp.ne.s32.totalorder %s721_s13, %s717_s12 }
   0x8   : > { %s926_s20 = smov (%p30_p0, %s28_s20), 0  ;;  %p122_p5 = scmp.eq.s32.totalorder %s554_s19, 1 }
   0x9   : > { %p803_p4 = por %p116_p2, %p115_p1  ;;  %s100_s23 = ssub.s32 %s733_s16, %s926_s20 }
   0xa   : > { %p557_p6 = scmp.ge.s32.totalorder %s737_s17, 1  ;;  %p103_p7 = scmp.eq.s32.totalorder %s100_s23, 0 }
   0xb   : > { %p810_p8 = por %p122_p5, %p121_p3  ;;  %p154_p9 = scmp.lt.s32.totalorder %s737_s17, 3 }
   0xc   : > { %s816_s25 = scalar_select %p103_p7, %s725_s14, %s105_s21  }
   0xd   : > { %p155_p10 = pnand %p557_p6, %p154_p9 }
   0xe   : > { %p178_p11 = scmp.lt.s32.totalorder (!%p155_p10), %s729_s15, 1  ;;  %s739_s4 = smov (!%p155_p10), 127  }
   0xf   : > { %158 = sbr.rel (%p155_p10) target bundleno = 294 (0x126), region = 32  ;;  %s175_s8 = sand.u32 (!%p155_p10), 1, %s721_s13  }
  0x10   : > { %s558_s9 = sshll.u32 (!%p155_p10), %s175_s8, 4  ;;  %s596_s11 = sshll.u32 (!%p155_p10), %s729_s15, 4 }
  0x11   : > { %s177_s10 = scalar_lea.vmem (!%p155_p10), [#allocation2], %s558_s9  ;;  %s477_s21 = scalar_lea.hbm (!%p155_p10), %s917_s3, %s596_s11 }
  0x12   : > { %s478_s23 = sshll.u32 (!%p155_p10), %s177_s10, 4  ;;  %s479_s23 = int_to_ptr.vmem [resolvable:$true] %s478_s23 }
  0x14   : > { %s179_s26 = scalar_select %p178_p11, %s729_s15, 1  ;;  %vm195_vm0 = vcmask 1043456   ;;  %vm191_vm1 = vcmask 31744   ;;  %v568_v4 = vld [vmem:[%s915_s1 + $0x38] sm:$0xff]  ;;  %v562_v6 = vld [vmem:[%s915_s1 + $0x20] sm:$0xff]  ;;  %v560_v8 = vld [vmem:[%s915_s1 + $0x8] sm:$0xff] }
  0x15   : > { %v285_v9 = vld [vmem:[%s915_s1] sm:$0xff]  ;;  %v577_v10 = vld [vmem:[%s915_s1 + $0x18] sm:$0xff]  ;;  %v740_v11 = vmov 0   ;;  %v571_v13 = vld [vmem:[%s915_s1 + $0x10] sm:$0xff]  ;;  %vm282_vm2 = vcmask 130048   ;;  %s465_s15 = scalar_lea.sflag [#allocation3], %s175_s8 }
  0x16   : > { %s597_s27 = smul.u32 12, %s179_s26  ;;  %657 = vset.pattern.permute.xlu1 %v740_v11  ;;  %v183_v12 = vld [vmem:[%s916_s2] sm:$0xff]  ;;  %658 = vset.pattern.permute.xlu0 %v740_v11  ;;  %v580_v17 = vld [vmem:[%s915_s1 + $0x28] sm:$0xff]  ;;  %v584_v18 = vld [vmem:[%s915_s1 + $0x30] sm:$0xff]  ;;  %s480_s26 = sshll.u32 %s477_s21, 4  ;;  %s481_s26 = int_to_ptr.hbm [resolvable:$true] %s480_s26 }
  0x17   : > { %v587_v14 = vld [vmem:[%s915_s1 + $0x40] sm:$0xff] }
  0x18   : > { %s182_s30 = scalar_lea.vmem %s914_s0, %s597_s27  ;;  %s673_s27 = sshra.s32 %s481_s26, 4  ;;  %s674_s27 = int_to_ptr.hbm [resolvable:$true] %s673_s27 }
  0x19   : > { %v284_v0 = vld [vmem:[%s182_s30] sm:$0xf]  ;;  %v583_v1 = vld [vmem:[%s182_s30 + $0x8] sm:$0xf]  ;;  %v576_v2 = vld [vmem:[%s182_s30 + $0x4] sm:$0xf]  ;;  %p680_p1 = scmp.lt.s32.totalorder %s674_s27, %s917_s3 }
  0x1a   : > { %289 = vrot.lane.b32.xlu0 %v284_v0, %s739_s4  ;;  %433 = vrot.lane.b32.xlu1 %v583_v1, %s739_s4  ;;  %v567_v3 = vld [vmem:[%s182_s30 + $0x8] sm:$0xf]  ;;  %v561_v5 = vld [vmem:[%s182_s30 + $0x4] sm:$0xf]  ;;  %s675_s28 = scalar_lea.hbm %s674_s27, 16 }
  0x1b   : > { %569 = vmatpush.msk.msra.mxu2 %vm195_vm0, %v567_v3  ;;  %563 = vmatpush.msk.msra.mxu0 %vm195_vm0, %v561_v5  ;;  %v184_v7 = vld [vmem:[%s182_s30] sm:$0xf]  ;;  %p676_p12 = scmp.ne.s32.totalorder %s674_s27, %s675_s28 }
  0x1c   : > { %570 = vmatmul.msk.f32.vlgmr.msra.gmra.mxu2 %vm191_vm1, %v568_v4  ;;  %564 = vmatmul.msk.f32.vlgmr.msra.gmra.mxu0 %vm191_vm1, %v562_v6 }
  0x1d   : > { %565 = vmatpush.msk.msra.mxu1 %vm195_vm0, %v184_v7  ;;  %574 = vmatpush.msk.msrb.mxu0 %vm195_vm0, %v284_v0  ;;  %p677_p13 = pnand %p676_p12, %p803_p4 }
  0x1e   : > { %566 = vmatmul.msk.f32.vlgmr.msra.gmra.mxu1 %vm191_vm1, %v560_v8 }
  0x1f   : > { %578 = vmatpush.msk.msrb.mxu1 %vm195_vm0, %v576_v2  ;;  %p678_p0 = pneg %p677_p13 }
  0x22   : > { %373 = vrot.lane.b32.xlu0 %v576_v2, %s739_s4  ;;  %278 = vperm.xlu1 %657, %v183_v12   ;;  %s679_s4 = scalar_lea.hbm %s917_s3, 32 }
  0x23   : > { %p681_p2 = scmp.lt.s32.totalorder %s679_s4, %s675_s28 }
  0x24   : > { %575 = vmatmul.msk.f32.vlgmr.msrb.gmra.mxu0 %vm191_vm1, %v285_v9 }
  0x25   : > { %p682_p3 = por %p681_p2, %p680_p1 }
  0x26   : > { %579 = vmatmul.msk.f32.vlgmr.msrb.gmra.mxu1 %vm191_vm1, %v577_v10 }
  0x27   : > { %p683_p5 = pnand %p682_p3, %p678_p0 }
  0x8c   : > { %v290_v15 = vpop.permute.xlu0 %289  ;;  %v434_v16 = vpop.permute.xlu1 %433 }
  0x8d   : > { %572 = vmatpush.msk.msra.mxu3 %vm195_vm0, %v290_v15  ;;  %588 = vmatpush.msk.msra.mxu0 %vm195_vm0, %v434_v16 }
  0x8e   : > { %573 = vmatmul.msk.f32.vlgmr.msra.gmra.mxu3 %vm191_vm1, %v571_v13  ;;  %589 = vmatmul.msk.f32.vlgmr.msra.gmra.mxu0 %vm191_vm1, %v587_v14 }
  0x8f   : > { %585 = vmatpush.msk.msrb.mxu3 %vm195_vm0, %v583_v1 }
  0x94   : > { %v374_v19 = vpop.permute.xlu0 %373  ;;  %v279_v24 = vpop.permute.xlu1 %278 }
  0x95   : > { %581 = vmatpush.msk.msrb.mxu2 %vm195_vm0, %v374_v19 }
  0x96   : > { %582 = vmatmul.msk.f32.vlgmr.msrb.gmra.mxu2 %vm191_vm1, %v580_v17  ;;  %586 = vmatmul.msk.f32.vlgmr.msrb.gmra.mxu3 %vm191_vm1, %v584_v18 }
  0x99   : > { %v216_v20 = vpop.f32.mrf.mxu0 }
  0x9b   : > { %v242_v21 = vpop.f32.mrf.mxu1 }
  0x9c   : > { %v243_v22 = vadd.f32 %v242_v21, %v216_v20 }
  0x9f   : > { %v272_v23 = vpop.f32.mrf.mxu2 }
  0xa0   : > { %v275_v25 = vadd.f32 %v272_v23, %v243_v22 }
  0xa1   : > { %v338_v28 = vpop.f32.mrf.mxu0 }
  0xa2   : > { %v281_v26 = vadd.f32 %v279_v24, %v275_v25 }
  0xa3   : > { %v367_v30 = vpop.f32.mrf.mxu1 }
  0xa4   : > { %283 = vst.msk [vmem:[%s177_s10] sm:$0xff] %vm282_vm2, %v281_v26 }
 0x10b   : > { %v457_v35 = vpop.f32.mrf.mxu0 }
 0x111   : > { %v313_v27 = vpop.f32.mrf.mxu3 }
 0x112   : > { %v339_v29 = vadd.f32 %v338_v28, %v313_v27 }
 0x114   : > { %v370_v31 = vadd.f32 %v367_v30, %v339_v29 }
 0x119   : > { %v397_v32 = vpop.f32.mrf.mxu2  ;;  %v427_v33 = vpop.f32.mrf.mxu3 }
 0x11a   : > { %v400_v34 = vadd.f32 %v397_v32, %v370_v31 }
 0x11c   : > { %v430_v36 = vadd.f32 %v427_v33, %v400_v34 }
 0x11e   : > { %v460_v37 = vadd.f32 %v457_v35, %v430_v36 }
 0x120   : > { %v461_v38 = vadd.f32 %v460_v37, %v279_v24 }
 0x122   : > { %590 = vst.msk [vmem:[%s177_s10 + $0x8] sm:$0xff] %vm282_vm2, %v461_v38 }
 0x123   : > { %686 = shalt.err (!%p683_p5)
}
 0x124   : > { %s741_s7 = smov 128   ;;  %s742_s8 = smov 8  }
 0x125   : > { %598 = dma.vmem_to_hbm [thread:$0]  (%p803_p4), %s479_s23, 256, %s481_s26, %s465_s15, %s741_s7, %s741_s7, %s742_s8  }
 0x126 PF: > { %p604_p6 = scmp.ge.s32.totalorder %s737_s17, 2  ;;  %s495_s9 = sand.u32 1, %s717_s12  }
 0x127   : > { %s496_s10 = scalar_lea.sflag [#allocation3], %s495_s9 }
 0x128   : > { %p601_p7 = pnand %p604_p6, %p810_p8 }
 0x12a   : > { %p602_p9 = pneg %p601_p7 }
 0x12c   : > { %712 = dma.done.wait (%p602_p9), %s496_s10, 256  }
 0x12d   : > { %714 = vsyncadd (%p602_p9), %s496_s10, 4294967040  ;;  %s16_s17 = sadd.s32 1, %s737_s17   ;;  %s920_s12 = smov %s721_s13 }
 0x12e   : > { %p13_p10 = scmp.ge.s32.totalorder %s16_s17, 4   ;;  %s921_s13 = smov %s725_s14 }
 0x12f   : > { %s922_s14 = smov %s816_s25  ;;  %s923_s15 = smov %s733_s16 }
 0x130   : > { %s924_s16 = smov %s926_s20  ;;  %15 = sbr.rel (!%p13_p10) target bundleno = 4 (0x4), region = 78 }
 0x135   :  { %502 = vsyncpa [#allocation3], 1 }
 0x136   :  { %504 = vsyncpa [#allocation3 + $0x1], 1 }

</bundles_post_ra>
